<compile_context>
chip_gen: v6e
topology: v6e:2x2x1
jax: 0.10.0
libtpu: 0.0.40
codegen_flags: <defaults>
</compile_context>

<pallas_src>
import functools

import jax
import jax.numpy as jnp
from jax.experimental import pallas as pl
from jax.experimental.pallas import tpu as pltpu

LANES = 128          # original batch rows packed per reshaped row / output lanes
IN_FEATURES = 9


def _linear_kernel(x_ref, w_ref, b_ref, o_ref):
    # x_ref: (TILE_R, 1152) VMEM      w_ref: (1152, 128) VMEM (grid-invariant)
    # b_ref: (1, 1)         SMEM      o_ref: (TILE_R, 128) VMEM (lane-dense)
    o_ref[...] = (
        jnp.dot(x_ref[...], w_ref[...], preferred_element_type=jnp.float32)
        + b_ref[0, 0]
    )


@functools.partial(jax.jit, static_argnames=("tile_rows",))
def single_neuron_forward(x, weight, bias, *, tile_rows=256):
    """out = x @ weight.T + bias for fc1 = nn.Linear(9, 1).

    x:      (N, 9) float32
    weight: (1, 9) float32  (PyTorch Linear layout: [out_features, in_features])
    bias:   (1,)   float32
    returns (N, 1) float32
    """
    n, f = x.shape
    x = x.astype(jnp.float32)
    weight = weight.astype(jnp.float32)
    bias = bias.astype(jnp.float32)

    # ---- Wrapper-side layout plumbing (cheap / free reshapes) --------------
    # Pad batch to a multiple of 128 so the contiguous reshape below is legal.
    n_pad = (-n) % LANES
    if n_pad:
        x = jnp.pad(x, ((0, n_pad), (0, 0)))
    r = x.shape[0] // LANES
    tile_r = min(tile_rows, r)              # full-extent block when r is small
    r_pad = (-r) % tile_r
    if r_pad:
        x = jnp.pad(x, ((0, r_pad * LANES), (0, 0)))
        r += r_pad
    # Free row-major reshape: x2[i, 9*k + j] == x[128*i + k, j].
    x2 = x.reshape(r, LANES * f)

    # Block-diagonal weight: w_bd[9*k + j, k] = weight[0, j]
    #   => (x2 @ w_bd)[i, k] == (x @ weight.T)[128*i + k, 0]
    w_bd = (
        jnp.eye(LANES, dtype=jnp.float32)[:, None, :] * weight.reshape(1, f, 1)
    ).reshape(LANES * f, LANES)

    b2d = bias.reshape(1, 1)

    grid = (r // tile_r,)
    out2 = pl.pallas_call(
        _linear_kernel,
        out_shape=jax.ShapeDtypeStruct((r, LANES), jnp.float32),
        grid_spec=pltpu.PrefetchScalarGridSpec(
            num_scalar_prefetch=0,
            grid=grid,
            in_specs=[
                # Batch tile: pipelined / double-buffered over the grid.
                pl.BlockSpec((tile_r, LANES * f), lambda i: (i, 0)),
                # Block-diagonal weight: same block every step -> stays resident.
                pl.BlockSpec((LANES * f, LANES), lambda i: (0, 0)),
                # Bias as an SMEM scalar (no padded VMEM tile).
                pl.BlockSpec(memory_space=pltpu.SMEM),
            ],
            out_specs=pl.BlockSpec((tile_r, LANES), lambda i: (i, 0)),
        ),
        compiler_params=pltpu.CompilerParams(
            dimension_semantics=("parallel",),   # dual-TC sharding on v7x
        ),
    )(x2, w_bd, b2d)

    # Undo the lane-dense packing: (R, 128) -> (R*128, 1), drop padding rows.
    return out2.reshape(r * LANES, 1)[:n]


if __name__ == "__main__":
    key = jax.random.PRNGKey(0)
    k_x, k_w, k_b = jax.random.split(key, 3)

    N, OUT_FEATURES = 8, 1
    x = jax.random.normal(k_x, (N, IN_FEATURES), dtype=jnp.float32)

    # Deterministic init mimicking PyTorch nn.Linear default:
    # U(-1/sqrt(in_features), 1/sqrt(in_features)).
    bound = 1.0 / jnp.sqrt(jnp.float32(IN_FEATURES))
    weight = jax.random.uniform(
        k_w, (OUT_FEATURES, IN_FEATURES), dtype=jnp.float32, minval=-bound, maxval=bound
    )
    bias = jax.random.uniform(
        k_b, (OUT_FEATURES,), dtype=jnp.float32, minval=-bound, maxval=bound
    )

    # Small demo batch (matches the module's Linear(9, 1) forward).
    out = jax.block_until_ready(single_neuron_forward(x, weight, bias))
    ref = x @ weight.T + bias
    assert out.shape == (N, OUT_FEATURES)
    assert jnp.allclose(out, ref, atol=1e-5, rtol=1e-5)

    # Exercise the batch-padding path (N not a multiple of 128).
    x_med = jax.random.normal(k_x, (1000, IN_FEATURES), dtype=jnp.float32)
    out_med = jax.block_until_ready(single_neuron_forward(x_med, weight, bias))
    ref_med = x_med @ weight.T + bias
    assert out_med.shape == (1000, 1)
    assert jnp.allclose(out_med, ref_med, atol=1e-5, rtol=1e-5)

    # Exercise the multi-tile grid path (grid > 1) with a small tile override.
    x_big = jax.random.normal(k_x, (4224, IN_FEATURES), dtype=jnp.float32)
    out_big = jax.block_until_ready(
        single_neuron_forward(x_big, weight, bias, tile_rows=8)
    )
    ref_big = x_big @ weight.T + bias
    assert out_big.shape == (4224, 1)
    assert jnp.allclose(out_big, ref_big, atol=1e-5, rtol=1e-5)

    print("KERNEL_OK")
</pallas_src>

<mosaic_0001>
module attributes {stable_mosaic.version = 11 : i64} {
  func.func @_linear_kernel(%arg0: i32, %arg1: memref<1x1152xf32, #tpu.memory_space<vmem>>, %arg2: memref<1152x128xf32, #tpu.memory_space<vmem>>, %arg3: memref<1x1xf32, #tpu.memory_space<smem>>, %arg4: memref<1x128xf32, #tpu.memory_space<vmem>>) attributes {dimension_semantics = [#tpu.dimension_semantics<parallel>], iteration_bounds = array<i64: 1>, scalar_prefetch = 0 : i64, scratch_operands = 0 : i64, tpu.core_type = #tpu.core_type<tc>, window_params = [{transform_indices = @transform_0, window_bounds = array<i64: 1, 1152>}, {pipeline_mode = #tpu.pipeline_mode<synchronous>, transform_indices = @transform_1, window_bounds = array<i64: 1152, 128>}, {transform_indices = @transform_2, window_bounds = array<i64: 1, 1>}, {transform_indices = @transform_3, window_bounds = array<i64: 1, 128>}]} {
    %c0 = arith.constant 0 : index
    %c0_0 = arith.constant 0 : index
    %0 = vector.load %arg1[%c0, %c0_0] : memref<1x1152xf32, #tpu.memory_space<vmem>>, vector<1x1152xf32>
    %c0_1 = arith.constant 0 : index
    %c0_2 = arith.constant 0 : index
    %1 = vector.load %arg2[%c0_1, %c0_2] : memref<1152x128xf32, #tpu.memory_space<vmem>>, vector<1152x128xf32>
    %cst = arith.constant dense<0.000000e+00> : vector<1x128xf32>
    %2 = tpu.matmul %0, %1, %cst {dimension_numbers = #tpu.dot_dimension_numbers<[1], [0], [0], [1], [0, 0, 1, 1], [], []>} : vector<1x1152xf32>, vector<1152x128xf32>, vector<1x128xf32> -> vector<1x128xf32>
    %c0_3 = arith.constant 0 : index
    %c0_4 = arith.constant 0 : index
    %3 = memref.load %arg3[%c0_3, %c0_4] : memref<1x1xf32, #tpu.memory_space<smem>>
    %4 = vector.broadcast %3 : f32 to vector<1x128xf32>
    %5 = arith.addf %2, %4 : vector<1x128xf32>
    %c0_5 = arith.constant 0 : index
    %c0_6 = arith.constant 0 : index
    %6 = vector.load %arg4[%c0_5, %c0_6] : memref<1x128xf32, #tpu.memory_space<vmem>>, vector<1x128xf32>
    tpu.vector_store %arg4[%c0_5, %c0_6], %5 {strides = array<i32>} : memref<1x128xf32, #tpu.memory_space<vmem>>, vector<1x128xf32>,
    return
  }
  func.func @transform_0(%arg0: i32) -> (i32, i32) {
    %c0_i32 = arith.constant 0 : i32
    %c0_i32_0 = arith.constant 0 : i32
    return %arg0, %c0_i32 : i32, i32
  }
  func.func @transform_1(%arg0: i32) -> (i32, i32) {
    %c0_i32 = arith.constant 0 : i32
    %c0_i32_0 = arith.constant 0 : i32
    %c0_i32_1 = arith.constant 0 : i32
    return %c0_i32, %c0_i32_0 : i32, i32
  }
  func.func @transform_2(%arg0: i32) -> (i32, i32) {
    %c0_i32 = arith.constant 0 : i32
    %c0_i32_0 = arith.constant 0 : i32
    %c0_i32_1 = arith.constant 0 : i32
    return %c0_i32, %c0_i32_0 : i32, i32
  }
  func.func @transform_3(%arg0: i32) -> (i32, i32) {
    %c0_i32 = arith.constant 0 : i32
    %c0_i32_0 = arith.constant 0 : i32
    return %arg0, %c0_i32 : i32, i32
  }
}

</mosaic_0001>

<bundles_post_ra>
// kernel: single_neuron_forward.1
= control target key start
LH: loop header
LB: loop body
LE: loop exit
PB: predicated region body
PF: predicated region fallthrough
CT: control target
= control target key end

     0   :  { %v165_v35 = vlaneseq  ;;  %vm761_vm0 = vmmov 0   ;;  %s1246_s1 = inlined_call_operand.vmem [shape: f32[1152,128], index: 1, kind: input, shape index: {}]   ;;  %s1247_s0 = inlined_call_operand.vmem [shape: f32[1,1152], index: 0, kind: input, shape index: {}]   ;;  %s1248_s2 = inlined_call_operand.<no memory space> [shape: f32[1,1], index: 2, kind: input, shape index: {}]   ;;  %s1249_s3 = inlined_call_operand.vmem [shape: f32[1,128], index: 3, kind: output, shape index: {}]  }
   0x1   :  { %v48_v0 = vld [vmem:[%s1246_s1 + $0xf8] sm:$0xff]  ;;  %v47_v2 = vld [vmem:[%s1246_s1 + $0xf0] sm:$0xff]  ;;  %v46_v6 = vld [vmem:[%s1246_s1 + $0xe8] sm:$0xff] }
   0x2   :  { %v32_v1 = vld [vmem:[%s1246_s1 + $0x78] sm:$0xff]  ;;  %566 = vmatprep.subr.mxu0 %v48_v0  ;;  %v31_v4 = vld [vmem:[%s1246_s1 + $0x70] sm:$0xff]  ;;  %v30_v8 = vld [vmem:[%s1246_s1 + $0x68] sm:$0xff]  ;;  %v911_v44 = vshrl.u32 %v165_v35, 7 }
   0x3   :  { %v80_v3 = vld [vmem:[%s1246_s1 + $0x1f8] sm:$0xff]  ;;  %567 = vmatpush3.msra.mxu0 %v32_v1  ;;  %v79_v7 = vld [vmem:[%s1246_s1 + $0x1f0] sm:$0xff]  ;;  %v78_v10 = vld [vmem:[%s1246_s1 + $0x1e8] sm:$0xff] }
   0x4   :  { %v64_v5 = vld [vmem:[%s1246_s1 + $0x178] sm:$0xff]  ;;  %601 = vmatprep.subr.mxu1 %v80_v3  ;;  %568 = vmatprep.subr.mxu0 %v47_v2  ;;  %v63_v9 = vld [vmem:[%s1246_s1 + $0x170] sm:$0xff]  ;;  %v45_v11 = vld [vmem:[%s1246_s1 + $0xe0] sm:$0xff]  ;;  %v171_v53 = vsub.s32 1, %v911_v44  ;;  %v167_v59 = vsub.s32 0, %v911_v44  ;;  %v179_v1 = vsub.s32 3, %v911_v44 }
   0x5   :  { %602 = vmatpush3.msra.mxu1 %v64_v5  ;;  %569 = vmatpush3.msra.mxu0 %v31_v4  ;;  %v62_v12 = vld [vmem:[%s1246_s1 + $0x168] sm:$0xff]  ;;  %v29_v13 = vld [vmem:[%s1246_s1 + $0x60] sm:$0xff]  ;;  %v44_v15 = vld [vmem:[%s1246_s1 + $0xd8] sm:$0xff]  ;;  %v175_v3 = vsub.s32 2, %v911_v44 }
   0x6   :  { %603 = vmatprep.subr.mxu1 %v79_v7  ;;  %570 = vmatprep.subr.mxu0 %v46_v6  ;;  %v77_v14 = vld [vmem:[%s1246_s1 + $0x1e0] sm:$0xff]  ;;  %v28_v17 = vld [vmem:[%s1246_s1 + $0x58] sm:$0xff]  ;;  %v43_v19 = vld [vmem:[%s1246_s1 + $0xd0] sm:$0xff] }
   0x7   :  { %604 = vmatpush3.msra.mxu1 %v63_v9  ;;  %571 = vmatpush3.msra.mxu0 %v30_v8  ;;  %v61_v16 = vld [vmem:[%s1246_s1 + $0x160] sm:$0xff]  ;;  %v76_v18 = vld [vmem:[%s1246_s1 + $0x1d8] sm:$0xff]  ;;  %v27_v21 = vld [vmem:[%s1246_s1 + $0x50] sm:$0xff] }
   0x8   :  { %605 = vmatprep.subr.mxu1 %v78_v10  ;;  %572 = vmatprep.subr.mxu0 %v45_v11  ;;  %v60_v20 = vld [vmem:[%s1246_s1 + $0x158] sm:$0xff]  ;;  %v75_v22 = vld [vmem:[%s1246_s1 + $0x1d0] sm:$0xff]  ;;  %v42_v23 = vld [vmem:[%s1246_s1 + $0xc8] sm:$0xff] }
   0x9   :  { %606 = vmatpush3.msra.mxu1 %v62_v12  ;;  %573 = vmatpush3.msra.mxu0 %v29_v13  ;;  %v59_v24 = vld [vmem:[%s1246_s1 + $0x150] sm:$0xff]  ;;  %v26_v25 = vld [vmem:[%s1246_s1 + $0x48] sm:$0xff]  ;;  %v41_v27 = vld [vmem:[%s1246_s1 + $0xc0] sm:$0xff] }
   0xa   :  { %607 = vmatprep.subr.mxu1 %v77_v14  ;;  %574 = vmatprep.subr.mxu0 %v44_v15  ;;  %v74_v26 = vld [vmem:[%s1246_s1 + $0x1c8] sm:$0xff]  ;;  %v25_v29 = vld [vmem:[%s1246_s1 + $0x40] sm:$0xff]  ;;  %v40_v31 = vld [vmem:[%s1246_s1 + $0xb8] sm:$0xff] }
   0xb   :  { %608 = vmatpush3.msra.mxu1 %v61_v16  ;;  %575 = vmatpush3.msra.mxu0 %v28_v17  ;;  %v58_v28 = vld [vmem:[%s1246_s1 + $0x148] sm:$0xff]  ;;  %v73_v30 = vld [vmem:[%s1246_s1 + $0x1c0] sm:$0xff]  ;;  %v24_v33 = vld [vmem:[%s1246_s1 + $0x38] sm:$0xff] }
   0xc   :  { %609 = vmatprep.subr.mxu1 %v76_v18  ;;  %576 = vmatprep.subr.mxu0 %v43_v19  ;;  %v57_v32 = vld [vmem:[%s1246_s1 + $0x140] sm:$0xff]  ;;  %v72_v34 = vld [vmem:[%s1246_s1 + $0x1b8] sm:$0xff]  ;;  %v39_v36 = vld [vmem:[%s1246_s1 + $0xb0] sm:$0xff] }
   0xd   :  { %610 = vmatpush3.msra.mxu1 %v60_v20  ;;  %577 = vmatpush3.msra.mxu0 %v27_v21  ;;  %v56_v37 = vld [vmem:[%s1246_s1 + $0x138] sm:$0xff]  ;;  %v23_v38 = vld [vmem:[%s1246_s1 + $0x30] sm:$0xff]  ;;  %v38_v40 = vld [vmem:[%s1246_s1 + $0xa8] sm:$0xff] }
   0xe   :  { %611 = vmatprep.subr.mxu1 %v75_v22  ;;  %578 = vmatprep.subr.mxu0 %v42_v23  ;;  %v71_v39 = vld [vmem:[%s1246_s1 + $0x1b0] sm:$0xff]  ;;  %v22_v42 = vld [vmem:[%s1246_s1 + $0x28] sm:$0xff]  ;;  %v37_v45 = vld [vmem:[%s1246_s1 + $0xa0] sm:$0xff] }
   0xf   :  { %612 = vmatpush3.msra.mxu1 %v59_v24  ;;  %579 = vmatpush3.msra.mxu0 %v26_v25  ;;  %v55_v41 = vld [vmem:[%s1246_s1 + $0x130] sm:$0xff]  ;;  %v70_v43 = vld [vmem:[%s1246_s1 + $0x1a8] sm:$0xff]  ;;  %v21_v47 = vld [vmem:[%s1246_s1 + $0x20] sm:$0xff] }
  0x10   :  { %613 = vmatprep.subr.mxu1 %v74_v26  ;;  %580 = vmatprep.subr.mxu0 %v41_v27  ;;  %v54_v46 = vld [vmem:[%s1246_s1 + $0x128] sm:$0xff]  ;;  %v69_v48 = vld [vmem:[%s1246_s1 + $0x1a0] sm:$0xff]  ;;  %v36_v49 = vld [vmem:[%s1246_s1 + $0x98] sm:$0xff] }
  0x11   :  { %614 = vmatpush3.msra.mxu1 %v58_v28  ;;  %581 = vmatpush3.msra.mxu0 %v25_v29  ;;  %v53_v50 = vld [vmem:[%s1246_s1 + $0x120] sm:$0xff]  ;;  %v20_v51 = vld [vmem:[%s1246_s1 + $0x18] sm:$0xff]  ;;  %v35_v54 = vld [vmem:[%s1246_s1 + $0x90] sm:$0xff] }
  0x12   :  { %615 = vmatprep.subr.mxu1 %v73_v30  ;;  %582 = vmatprep.subr.mxu0 %v40_v31  ;;  %v68_v52 = vld [vmem:[%s1246_s1 + $0x198] sm:$0xff]  ;;  %v947_v56 = vld [vmem:[%s1247_s0] sm:$0xff]  ;;  %v19_v57 = vld [vmem:[%s1246_s1 + $0x10] sm:$0xff] }
  0x13   :  { %616 = vmatpush3.msra.mxu1 %v57_v32  ;;  %583 = vmatpush3.msra.mxu0 %v24_v33  ;;  %v52_v55 = vld [vmem:[%s1246_s1 + $0x118] sm:$0xff]  ;;  %v67_v58 = vld [vmem:[%s1246_s1 + $0x190] sm:$0xff]  ;;  %v34_v60 = vld [vmem:[%s1246_s1 + $0x88] sm:$0xff]  ;;  %v172_v0 = vrot.slane %v947_v56, %v171_v53  ;;  %v168_v6 = vrot.slane %v947_v56, %v167_v59  ;;  %v180_v10 = vrot.slane %v947_v56, %v179_v1 }
  0x14   :  { %617 = vmatprep.subr.mxu1 %v72_v34  ;;  %584 = vmatprep.subr.mxu0 %v39_v36  ;;  %v51_v61 = vld [vmem:[%s1246_s1 + $0x110] sm:$0xff]  ;;  %v18_v62 = vld [vmem:[%s1246_s1 + $0x8] sm:$0xff]  ;;  %v33_v2 = vld [vmem:[%s1246_s1 + $0x80] sm:$0xff]  ;;  %v176_v12 = vrot.slane %v947_v56, %v175_v3 }
  0x15   :  { %618 = vmatpush3.msra.mxu1 %v56_v37  ;;  %585 = vmatpush3.msra.mxu0 %v23_v38  ;;  %v66_v63 = vld [vmem:[%s1246_s1 + $0x188] sm:$0xff]  ;;  %v17_v4 = vld [vmem:[%s1246_s1] sm:$0xff]  ;;  %v112_v8 = vld [vmem:[%s1246_s1 + $0x2f8] sm:$0xff] }
  0x16   :  { %619 = vmatprep.subr.mxu1 %v71_v39  ;;  %586 = vmatprep.subr.mxu0 %v38_v40  ;;  %v50_v5 = vld [vmem:[%s1246_s1 + $0x108] sm:$0xff]  ;;  %v65_v7 = vld [vmem:[%s1246_s1 + $0x180] sm:$0xff]  ;;  %v96_v11 = vld [vmem:[%s1246_s1 + $0x278] sm:$0xff] }
  0x17   :  { %620 = vmatpush3.msra.mxu1 %v55_v41  ;;  %587 = vmatpush3.msra.mxu0 %v22_v42  ;;  %v49_v9 = vld [vmem:[%s1246_s1 + $0x100] sm:$0xff]  ;;  %v111_v13 = vld [vmem:[%s1246_s1 + $0x2f0] sm:$0xff]  ;;  %v144_v14 = vld [vmem:[%s1246_s1 + $0x3f8] sm:$0xff] }
  0x18   :  { %621 = vmatprep.subr.mxu1 %v70_v43  ;;  %588 = vmatprep.subr.mxu0 %v37_v45  ;;  %v95_v15 = vld [vmem:[%s1246_s1 + $0x270] sm:$0xff]  ;;  %v128_v16 = vld [vmem:[%s1246_s1 + $0x378] sm:$0xff]  ;;  %v110_v17 = vld [vmem:[%s1246_s1 + $0x2e8] sm:$0xff] }
  0x19   :  { %622 = vmatpush3.msra.mxu1 %v54_v46  ;;  %589 = vmatpush3.msra.mxu0 %v21_v47  ;;  %v143_v18 = vld [vmem:[%s1246_s1 + $0x3f0] sm:$0xff]  ;;  %v94_v19 = vld [vmem:[%s1246_s1 + $0x268] sm:$0xff]  ;;  %v109_v21 = vld [vmem:[%s1246_s1 + $0x2e0] sm:$0xff] }
  0x1a   :  { %623 = vmatprep.subr.mxu1 %v69_v48  ;;  %590 = vmatprep.subr.mxu0 %v36_v49  ;;  %v127_v20 = vld [vmem:[%s1246_s1 + $0x370] sm:$0xff]  ;;  %v142_v22 = vld [vmem:[%s1246_s1 + $0x3e8] sm:$0xff]  ;;  %v93_v23 = vld [vmem:[%s1246_s1 + $0x260] sm:$0xff] }
  0x1b   :  { %624 = vmatpush3.msra.mxu1 %v53_v50  ;;  %591 = vmatpush3.msra.mxu0 %v20_v51  ;;  %v126_v24 = vld [vmem:[%s1246_s1 + $0x368] sm:$0xff]  ;;  %v108_v25 = vld [vmem:[%s1246_s1 + $0x2d8] sm:$0xff]  ;;  %v141_v26 = vld [vmem:[%s1246_s1 + $0x3e0] sm:$0xff] }
  0x1c   :  { %625 = vmatprep.subr.mxu1 %v68_v52  ;;  %592 = vmatprep.subr.mxu0 %v35_v54  ;;  %v92_v27 = vld [vmem:[%s1246_s1 + $0x258] sm:$0xff]  ;;  %v125_v28 = vld [vmem:[%s1246_s1 + $0x360] sm:$0xff]  ;;  %v107_v29 = vld [vmem:[%s1246_s1 + $0x2d0] sm:$0xff] }
  0x1d   :  { %626 = vmatpush3.msra.mxu1 %v52_v55  ;;  %593 = vmatpush3.msra.mxu0 %v19_v57  ;;  %v140_v30 = vld [vmem:[%s1246_s1 + $0x3d8] sm:$0xff]  ;;  %v91_v31 = vld [vmem:[%s1246_s1 + $0x250] sm:$0xff]  ;;  %v106_v33 = vld [vmem:[%s1246_s1 + $0x2c8] sm:$0xff] }
  0x1e   :  { %627 = vmatprep.subr.mxu1 %v67_v58  ;;  %594 = vmatprep.subr.mxu0 %v34_v60  ;;  %v124_v32 = vld [vmem:[%s1246_s1 + $0x358] sm:$0xff]  ;;  %v139_v34 = vld [vmem:[%s1246_s1 + $0x3d0] sm:$0xff]  ;;  %v90_v35 = vld [vmem:[%s1246_s1 + $0x248] sm:$0xff] }
  0x1f   :  { %628 = vmatpush3.msra.mxu1 %v51_v61  ;;  %595 = vmatpush3.msra.mxu0 %v18_v62  ;;  %v123_v36 = vld [vmem:[%s1246_s1 + $0x350] sm:$0xff]  ;;  %v105_v37 = vld [vmem:[%s1246_s1 + $0x2c0] sm:$0xff]  ;;  %v138_v38 = vld [vmem:[%s1246_s1 + $0x3c8] sm:$0xff] }
  0x20   :  { %629 = vmatprep.subr.mxu1 %v66_v63  ;;  %596 = vmatprep.subr.mxu0 %v33_v2  ;;  %v89_v39 = vld [vmem:[%s1246_s1 + $0x240] sm:$0xff]  ;;  %v122_v40 = vld [vmem:[%s1246_s1 + $0x348] sm:$0xff]  ;;  %v104_v41 = vld [vmem:[%s1246_s1 + $0x2b8] sm:$0xff]  ;;  %v187_v2 = vsub.s32 5, %v911_v44 }
  0x21   :  { %274 = vmatprep.mubr.f32.mxu0 %v172_v0  ;;  %597 = vmatpush3.msra.mxu0 %v17_v4  ;;  %v137_v42 = vld [vmem:[%s1246_s1 + $0x3c0] sm:$0xff]  ;;  %v88_v43 = vld [vmem:[%s1246_s1 + $0x238] sm:$0xff]  ;;  %v103_v46 = vld [vmem:[%s1246_s1 + $0x2b0] sm:$0xff] }
  0x22   :  { %630 = vmatpush3.msra.mxu1 %v50_v5  ;;  %275 = vmatmul.mubr.f32.vlgmr.msra.gmra.mxu0 %v168_v6  ;;  %v121_v45 = vld [vmem:[%s1246_s1 + $0x340] sm:$0xff]  ;;  %v136_v47 = vld [vmem:[%s1246_s1 + $0x3b8] sm:$0xff]  ;;  %v87_v48 = vld [vmem:[%s1246_s1 + $0x230] sm:$0xff]  ;;  %v183_v5 = vsub.s32 4, %v911_v44 }
  0x23   :  { %631 = vmatprep.subr.mxu1 %v65_v7  ;;  %636 = vmatprep.subr.mxu0 %v112_v8  ;;  %v120_v49 = vld [vmem:[%s1246_s1 + $0x338] sm:$0xff]  ;;  %v102_v50 = vld [vmem:[%s1246_s1 + $0x2a8] sm:$0xff]  ;;  %v135_v51 = vld [vmem:[%s1246_s1 + $0x3b0] sm:$0xff] }
  0x24   :  { %632 = vmatpush3.msra.mxu1 %v49_v9  ;;  %344 = vmatprep.mubr.f32.mxu1 %v180_v10  ;;  %v86_v52 = vld [vmem:[%s1246_s1 + $0x228] sm:$0xff]  ;;  %v119_v53 = vld [vmem:[%s1246_s1 + $0x330] sm:$0xff]  ;;  %v101_v54 = vld [vmem:[%s1246_s1 + $0x2a0] sm:$0xff]  ;;  %v195_v10 = vsub.s32 7, %v911_v44 }
  0x25   :  { %637 = vmatpush3.msra.mxu0 %v96_v11  ;;  %345 = vmatmul.mubr.f32.vlgmr.msra.gmra.mxu1 %v176_v12  ;;  %v134_v55 = vld [vmem:[%s1246_s1 + $0x3a8] sm:$0xff]  ;;  %v85_v57 = vld [vmem:[%s1246_s1 + $0x220] sm:$0xff]  ;;  %v100_v59 = vld [vmem:[%s1246_s1 + $0x298] sm:$0xff] }
  0x26   :  { %638 = vmatprep.subr.mxu0 %v111_v13  ;;  %671 = vmatprep.subr.mxu1 %v144_v14  ;;  %v118_v58 = vld [vmem:[%s1246_s1 + $0x328] sm:$0xff]  ;;  %v133_v60 = vld [vmem:[%s1246_s1 + $0x3a0] sm:$0xff]  ;;  %v84_v61 = vld [vmem:[%s1246_s1 + $0x218] sm:$0xff]  ;;  %v188_v13 = vrot.slane %v947_v56, %v187_v2  ;;  %v191_v14 = vsub.s32 6, %v911_v44 }
  0x27   :  { %639 = vmatpush3.msra.mxu0 %v95_v15  ;;  %672 = vmatpush3.msra.mxu1 %v128_v16  ;;  %v117_v62 = vld [vmem:[%s1246_s1 + $0x320] sm:$0xff]  ;;  %v99_v63 = vld [vmem:[%s1246_s1 + $0x290] sm:$0xff]  ;;  %v132_v0 = vld [vmem:[%s1246_s1 + $0x398] sm:$0xff]  ;;  %v184_v16 = vrot.slane %v947_v56, %v183_v5 }
  0x28   :  { %640 = vmatprep.subr.mxu0 %v110_v17  ;;  %673 = vmatprep.subr.mxu1 %v143_v18  ;;  %v83_v1 = vld [vmem:[%s1246_s1 + $0x210] sm:$0xff]  ;;  %v116_v3 = vld [vmem:[%s1246_s1 + $0x318] sm:$0xff]  ;;  %v98_v4 = vld [vmem:[%s1246_s1 + $0x288] sm:$0xff]  ;;  %v196_v18 = vrot.slane %v947_v56, %v195_v10 }
  0x29   :  { %641 = vmatpush3.msra.mxu0 %v94_v19  ;;  %674 = vmatpush3.msra.mxu1 %v127_v20  ;;  %v131_v6 = vld [vmem:[%s1246_s1 + $0x390] sm:$0xff]  ;;  %v82_v7 = vld [vmem:[%s1246_s1 + $0x208] sm:$0xff]  ;;  %v97_v9 = vld [vmem:[%s1246_s1 + $0x280] sm:$0xff]  ;;  %v192_v20 = vrot.slane %v947_v56, %v191_v14 }
  0x2a   :  { %642 = vmatprep.subr.mxu0 %v109_v21  ;;  %675 = vmatprep.subr.mxu1 %v142_v22  ;;  %v115_v8 = vld [vmem:[%s1246_s1 + $0x310] sm:$0xff]  ;;  %v130_v11 = vld [vmem:[%s1246_s1 + $0x388] sm:$0xff]  ;;  %v81_v12 = vld [vmem:[%s1246_s1 + $0x200] sm:$0xff]  ;;  %v760_v21 = vmov 0.0  }
  0x2b   :  { %643 = vmatpush3.msra.mxu0 %v93_v23  ;;  %676 = vmatpush3.msra.mxu1 %v126_v24  ;;  %v114_v15 = vld [vmem:[%s1246_s1 + $0x308] sm:$0xff]  ;;  %v129_v17 = vld [vmem:[%s1246_s1 + $0x380] sm:$0xff]  ;;  %v160_v19 = vld [vmem:[%s1246_s1 + $0x478] sm:$0xff] }
  0x2c   :  { %644 = vmatprep.subr.mxu0 %v108_v25  ;;  %677 = vmatprep.subr.mxu1 %v141_v26  ;;  %v113_v44 = vld [vmem:[%s1246_s1 + $0x300] sm:$0xff]  ;;  %v159_v22 = vld [vmem:[%s1246_s1 + $0x470] sm:$0xff]  ;;  %v158_v23 = vld [vmem:[%s1246_s1 + $0x468] sm:$0xff] }
  0x2d   :  { %645 = vmatpush3.msra.mxu0 %v92_v27  ;;  %678 = vmatpush3.msra.mxu1 %v125_v28  ;;  %v157_v56 = vld [vmem:[%s1246_s1 + $0x460] sm:$0xff]  ;;  %v156_v24 = vld [vmem:[%s1246_s1 + $0x458] sm:$0xff]  ;;  %v155_v25 = vld [vmem:[%s1246_s1 + $0x450] sm:$0xff] }
  0x2e   :  { %646 = vmatprep.subr.mxu0 %v107_v29  ;;  %679 = vmatprep.subr.mxu1 %v140_v30  ;;  %v154_v26 = vld [vmem:[%s1246_s1 + $0x448] sm:$0xff]  ;;  %v153_v27 = vld [vmem:[%s1246_s1 + $0x440] sm:$0xff]  ;;  %v152_v28 = vld [vmem:[%s1246_s1 + $0x438] sm:$0xff] }
  0x2f   :  { %647 = vmatpush3.msra.mxu0 %v91_v31  ;;  %680 = vmatpush3.msra.mxu1 %v124_v32  ;;  %v151_v29 = vld [vmem:[%s1246_s1 + $0x430] sm:$0xff]  ;;  %v150_v30 = vld [vmem:[%s1246_s1 + $0x428] sm:$0xff]  ;;  %v149_v31 = vld [vmem:[%s1246_s1 + $0x420] sm:$0xff] }
  0x30   :  { %648 = vmatprep.subr.mxu0 %v106_v33  ;;  %681 = vmatprep.subr.mxu1 %v139_v34  ;;  %v148_v32 = vld [vmem:[%s1246_s1 + $0x418] sm:$0xff]  ;;  %v147_v33 = vld [vmem:[%s1246_s1 + $0x410] sm:$0xff]  ;;  %v146_v34 = vld [vmem:[%s1246_s1 + $0x408] sm:$0xff] }
  0x31   :  { %649 = vmatpush3.msra.mxu0 %v90_v35  ;;  %682 = vmatpush3.msra.mxu1 %v123_v36  ;;  %v145_v35 = vld [vmem:[%s1246_s1 + $0x400] sm:$0xff]  ;;  %v565_v36 = vld [vmem:[%s1247_s0 + $0x8] ss:$0 sm:$0xff] }
  0x32   :  { %650 = vmatprep.subr.mxu0 %v105_v37  ;;  %683 = vmatprep.subr.mxu1 %v138_v38 }
  0x33   :  { %651 = vmatpush3.msra.mxu0 %v89_v39  ;;  %684 = vmatpush3.msra.mxu1 %v122_v40 }
  0x34   :  { %652 = vmatprep.subr.mxu0 %v104_v41  ;;  %685 = vmatprep.subr.mxu1 %v137_v42  ;;  %v162_v42 = vstv %s1248_s2 }
  0x35   :  { %653 = vmatpush3.msra.mxu0 %v88_v43  ;;  %686 = vmatpush3.msra.mxu1 %v121_v45 }
  0x36   :  { %654 = vmatprep.subr.mxu0 %v103_v46  ;;  %687 = vmatprep.subr.mxu1 %v136_v47 }
  0x37   :  { %655 = vmatpush3.msra.mxu0 %v87_v48  ;;  %688 = vmatpush3.msra.mxu1 %v120_v49 }
  0x38   :  { %656 = vmatprep.subr.mxu0 %v102_v50  ;;  %689 = vmatprep.subr.mxu1 %v135_v51 }
  0x39   :  { %657 = vmatpush3.msra.mxu0 %v86_v52  ;;  %690 = vmatpush3.msra.mxu1 %v119_v53 }
  0x3a   :  { %658 = vmatprep.subr.mxu0 %v101_v54  ;;  %691 = vmatprep.subr.mxu1 %v134_v55 }
  0x3b   :  { %659 = vmatpush3.msra.mxu0 %v85_v57  ;;  %692 = vmatpush3.msra.mxu1 %v118_v58 }
  0x3c   :  { %660 = vmatprep.subr.mxu0 %v100_v59  ;;  %693 = vmatprep.subr.mxu1 %v133_v60 }
  0x3d   :  { %661 = vmatpush3.msra.mxu0 %v84_v61  ;;  %694 = vmatpush3.msra.mxu1 %v117_v62 }
  0x3e   :  { %662 = vmatprep.subr.mxu0 %v99_v63  ;;  %695 = vmatprep.subr.mxu1 %v132_v0 }
  0x3f   :  { %663 = vmatpush3.msra.mxu0 %v83_v1  ;;  %696 = vmatpush3.msra.mxu1 %v116_v3 }
  0x40   :  { %664 = vmatprep.subr.mxu0 %v98_v4  ;;  %697 = vmatprep.subr.mxu1 %v131_v6 }
  0x41   :  { %665 = vmatpush3.msra.mxu0 %v82_v7  ;;  %698 = vmatpush3.msra.mxu1 %v115_v8 }
  0x42   :  { %666 = vmatprep.subr.mxu0 %v97_v9  ;;  %699 = vmatprep.subr.mxu1 %v130_v11 }
  0x43   :  { %667 = vmatpush3.msra.mxu0 %v81_v12  ;;  %414 = vmatprep.mubr.f32.mxu0 %v188_v13 }
  0x44   :  { %700 = vmatpush3.msra.mxu1 %v114_v15  ;;  %415 = vmatmul.mubr.f32.vlgmr.msra.gmra.mxu0 %v184_v16 }
  0x45   :  { %701 = vmatprep.subr.mxu1 %v129_v17  ;;  %723 = vmatprep.subr.mxu0 %v760_v21 }
  0x46   :  { %702 = vmatpush3.msra.mxu1 %v113_v44  ;;  %484 = vmatprep.mubr.f32.mxu1 %v196_v18 }
  0x47   :  { %724 = vmatpush3.msra.mxu0 %v160_v19  ;;  %485 = vmatmul.mubr.f32.vlgmr.msra.gmra.mxu1 %v192_v20 }
  0x48   :  { %725 = vmatprep.subr.mxu0 %v760_v21  ;;  %755 = vmatprep.mubr.msk.f32.mxu0 %vm761_vm0, %v760_v21 }
  0x49   :  { %726 = vmatpush3.msra.mxu0 %v159_v22 }
  0x4a   :  { %727 = vmatprep.subr.mxu0 %v760_v21 }
  0x4b   :  { %728 = vmatpush3.msra.mxu0 %v158_v23 }
  0x4c   :  { %729 = vmatprep.subr.mxu0 %v760_v21 }
  0x4d   :  { %730 = vmatpush3.msra.mxu0 %v157_v56 }
  0x4e   :  { %731 = vmatprep.subr.mxu0 %v760_v21 }
  0x4f   :  { %732 = vmatpush3.msra.mxu0 %v156_v24 }
  0x50   :  { %733 = vmatprep.subr.mxu0 %v760_v21 }
  0x51   :  { %734 = vmatpush3.msra.mxu0 %v155_v25 }
  0x52   :  { %735 = vmatprep.subr.mxu0 %v760_v21 }
  0x53   :  { %736 = vmatpush3.msra.mxu0 %v154_v26 }
  0x54   :  { %737 = vmatprep.subr.mxu0 %v760_v21 }
  0x55   :  { %738 = vmatpush3.msra.mxu0 %v153_v27 }
  0x56   :  { %739 = vmatprep.subr.mxu0 %v760_v21 }
  0x57   :  { %740 = vmatpush3.msra.mxu0 %v152_v28 }
  0x58   :  { %741 = vmatprep.subr.mxu0 %v760_v21 }
  0x59   :  { %742 = vmatpush3.msra.mxu0 %v151_v29 }
  0x5a   :  { %743 = vmatprep.subr.mxu0 %v760_v21 }
  0x5b   :  { %744 = vmatpush3.msra.mxu0 %v150_v30 }
  0x5c   :  { %745 = vmatprep.subr.mxu0 %v760_v21 }
  0x5d   :  { %746 = vmatpush3.msra.mxu0 %v149_v31 }
  0x5e   :  { %747 = vmatprep.subr.mxu0 %v760_v21 }
  0x5f   :  { %748 = vmatpush3.msra.mxu0 %v148_v32 }
  0x60   :  { %749 = vmatprep.subr.mxu0 %v760_v21 }
  0x61   :  { %750 = vmatpush3.msra.mxu0 %v147_v33 }
  0x62   :  { %751 = vmatprep.subr.mxu0 %v760_v21 }
  0x63   :  { %752 = vmatpush3.msra.mxu0 %v146_v34 }
  0x64   :  { %753 = vmatprep.subr.mxu0 %v760_v21 }
  0x65   :  { %754 = vmatpush3.msra.mxu0 %v145_v35 }
  0x66   :  { %756 = vmatmul.mubr.f32.vlgmr.msra.gmra.mxu0 %v565_v36 }
  0xe2   :  { %v598_v37 = vpop.f32.mrf.mxu0 }
  0xe4   :  { %v599_v38 = vpop.f32.mrf.mxu0 }
  0xe5   :  { %v633_v39 = vpop.f32.mrf.mxu1  ;;  %v600_v41 = vadd.f32 %v599_v38, %v598_v37 }
  0xe7   :  { %v634_v43 = vpop.f32.mrf.mxu1  ;;  %v277_v47 = vadd.f32 %v600_v41, %v162_v42 }
  0xe8   :  { %v635_v48 = vadd.f32 %v634_v43, %v633_v39 }
  0xea   :  { %v347_v51 = vadd.f32 %v635_v48, %v277_v47 }
 0x104   :  { %v668_v40 = vpop.f32.mrf.mxu0 }
 0x106   :  { %v669_v45 = vpop.f32.mrf.mxu0 }
 0x107   :  { %v703_v46 = vpop.f32.mrf.mxu1  ;;  %v670_v49 = vadd.f32 %v669_v45, %v668_v40 }
 0x109   :  { %v704_v50 = vpop.f32.mrf.mxu1  ;;  %v417_v52 = vadd.f32 %v670_v49, %v347_v51 }
 0x10a   :  { %v705_v53 = vadd.f32 %v704_v50, %v703_v46 }
 0x10c   :  { %v487_v54 = vadd.f32 %v705_v53, %v417_v52 }
 0x126   :  { %v556_v55 = vpop.f32.mrf.mxu0 }
 0x127   :  { %v557_v57 = vadd.f32 %v556_v55, %v487_v54 }
 0x128   :  { %v757_v58 = vpop.f32.mrf.mxu0 }
 0x129   :  { %560 = vst [vmem:[%s1249_s3] sm:$0x1] %v557_v57 }

</bundles_post_ra>
